<compile_context>
chip_gen: v5e
topology: v5e:2x2
jax: 0.10.0
libtpu: 0.0.40
codegen_flags: <defaults>
</compile_context>

<pallas_src>
import functools

import jax
import jax.numpy as jnp
from jax import lax
from jax.experimental import pallas as pl
from jax.experimental.pallas import tpu as pltpu


# ---------------------------------------------------------------------------
# Kernels
# ---------------------------------------------------------------------------
def _linear_kernel_acc(x_ref, w_ref, o_ref, acc_ref, *, compute_dtype):
    """Tiled K-reduction. x_ref: (tm, tk); w_ref: (tn, tk); o_ref: (tm, tn)."""
    k = pl.program_id(2)

    @pl.when(k == 0)
    def _():
        acc_ref[...] = jnp.zeros_like(acc_ref)

    x = x_ref[...]
    w = w_ref[...]
    if compute_dtype is not None:
        x = x.astype(compute_dtype)
        w = w.astype(compute_dtype)

    # out[m, n] += sum_k x[m, k] * w[n, k]  (PyTorch layout, no transpose)
    acc_ref[...] += lax.dot_general(
        x,
        w,
        dimension_numbers=(((1,), (1,)), ((), ())),
        preferred_element_type=jnp.float32,
    )

    @pl.when(k == pl.num_programs(2) - 1)
    def _():
        o_ref[...] = acc_ref[...].astype(o_ref.dtype)


def _linear_kernel_single_k(x_ref, w_ref, o_ref, *, compute_dtype):
    """Whole K fits in one block: no accumulator / scratch needed."""
    x = x_ref[...]
    w = w_ref[...]
    if compute_dtype is not None:
        x = x.astype(compute_dtype)
        w = w.astype(compute_dtype)
    o_ref[...] = lax.dot_general(
        x,
        w,
        dimension_numbers=(((1,), (1,)), ((), ())),
        preferred_element_type=jnp.float32,
    ).astype(o_ref.dtype)


# ---------------------------------------------------------------------------
# Tile selection helpers
# ---------------------------------------------------------------------------
def _round_up(x, m):
    return ((x + m - 1) // m) * m


def _vmem_capacity_bytes():
    try:
        return int(pltpu.get_tpu_info().vmem_capacity_bytes)
    except Exception:
        return 64 << 20  # conservative (v7x-sized) fallback


def _pick_mn_tile(dim, target, align=128):
    """Tile for a batch/output axis. Edge blocks may be partial: Pallas only
    writes back the valid region, so cdiv padding is safe here."""
    if dim <= target:
        return dim  # full-extent block (always satisfies the (8,128) rule)
    return max(align, (target // align) * align)


def _pick_k_tile(k_dim, target):
    """Tile for the contraction axis. Padded K blocks would accumulate garbage,
    so the tile must divide K exactly (or be the full K)."""
    if k_dim <= target:
        return k_dim
    t = (target // 128) * 128
    for cand in range(t, 127, -128):
        if k_dim % cand == 0:
            return cand
    # TODO(synk): mask the K tail in-kernel instead of falling back to a full-K
    # block when input_size is huge and has no 128-multiple divisor <= target.
    return k_dim


# ---------------------------------------------------------------------------
# Wrapper
# ---------------------------------------------------------------------------
def one_param_forward(x, weight, *, compute_dtype=None):
    """x: [batch, input_size]; weight: [output_size, input_size] (PyTorch layout).

    compute_dtype: optionally cast tiles (e.g. jnp.bfloat16) before the MXU dot;
    accumulation stays f32. Default None keeps full f32 semantics.
    """
    batch, input_size = x.shape
    output_size, w_k = weight.shape
    assert w_k == input_size

    x_b = jnp.dtype(x.dtype).itemsize
    w_b = jnp.dtype(weight.dtype).itemsize
    o_b = jnp.dtype(x.dtype).itemsize

    # Per-generation VMEM budget: ~3/4 of physical, capped, minus headroom.
    capacity = _vmem_capacity_bytes()
    vmem_limit = int(min(capacity * 3 // 4, 96 << 20))
    tile_budget = max(vmem_limit - (8 << 20), 16 << 20)

    # Tile-size targets; shrink until the double-buffered working set fits.
    tm_t, tn_t, tk_t = 512, 1024, 2048

    def working_set(tm, tn, tk):
        return (2 * tm * tk * x_b      # x tile, double-buffered
                + 2 * tn * tk * w_b    # w tile, double-buffered
                + 2 * tm * tn * o_b    # out tile, double-buffered
                + tm * tn * 4)         # f32 accumulator

    while working_set(min(batch, tm_t), min(output_size, tn_t),
                      min(input_size, tk_t)) > tile_budget:
        if tk_t > 512:
            tk_t //= 2
        elif tn_t > 256:
            tn_t //= 2
        elif tm_t > 128:
            tm_t //= 2
        else:
            break

    tm = _pick_mn_tile(batch, tm_t)          # small batch -> tm = batch:
    tn = _pick_mn_tile(output_size, tn_t)    #   W streams from HBM exactly once
    tk = _pick_k_tile(input_size, tk_t)

    grid_m = pl.cdiv(batch, tm)
    grid_n = pl.cdiv(output_size, tn)
    grid_k = pl.cdiv(input_size, tk)

    # v7x has 2 TensorCores: make sure a "parallel" axis has >= 2 blocks when
    # the shape allows it (harmless ~0.35 us extra step on single-TC v5e/v6e).
    if grid_m == 1 and grid_n == 1 and output_size >= 256:
        tn = _round_up(pl.cdiv(output_size, 2), 128)
        grid_n = pl.cdiv(output_size, tn)

    grid = (grid_m, grid_n, grid_k)

    # Realistic tiled-traffic estimate (x re-read per N block, W per M block).
    cost = pl.CostEstimate(
        flops=2 * batch * input_size * output_size,
        transcendentals=0,
        bytes_accessed=(
            batch * input_size * x_b * grid_n
            + output_size * input_size * w_b * grid_m
            + batch * output_size * o_b
        ),
    )

    in_specs = [
        pl.BlockSpec((tm, tk), lambda i, j, k: (i, k)),
        # PyTorch-layout weight tiled as (tn, tk); no transpose anywhere.
        pl.BlockSpec((tn, tk), lambda i, j, k: (j, k)),
    ]
    out_spec = pl.BlockSpec((tm, tn), lambda i, j, k: (i, j))

    if grid_k == 1:
        kernel = functools.partial(_linear_kernel_single_k,
                                   compute_dtype=compute_dtype)
        scratch = []
    else:
        kernel = functools.partial(_linear_kernel_acc,
                                   compute_dtype=compute_dtype)
        scratch = [pltpu.VMEM((tm, tn), jnp.float32)]

    return pl.pallas_call(
        kernel,
        out_shape=jax.ShapeDtypeStruct((batch, output_size), x.dtype),
        grid_spec=pl.GridSpec(
            grid=grid,
            in_specs=in_specs,
            out_specs=out_spec,
            scratch_shapes=scratch,
        ),
        compiler_params=pltpu.CompilerParams(
            dimension_semantics=("parallel", "parallel", "arbitrary"),
            vmem_limit_bytes=vmem_limit,
        ),
        cost_estimate=cost,
    )(x, weight)


if __name__ == "__main__":
    key = jax.random.PRNGKey(0)
    kx, kw = jax.random.split(key)

    batch = 8
    input_size = 32
    output_size = 16

    # Deterministic synthetic inputs / parameters (PyTorch nn.Linear layout).
    x = jax.random.normal(kx, (batch, input_size), dtype=jnp.float32)
    bound = 1.0 / jnp.sqrt(input_size)
    weight = jax.random.uniform(
        kw, (output_size, input_size), dtype=jnp.float32, minval=-bound, maxval=bound
    )

    yhat = one_param_forward(x, weight)
    yhat = jax.block_until_ready(yhat)

    # Reference check against plain JAX (same semantics as PyTorch x @ W.T).
    ref = x @ weight.T
    assert yhat.shape == (batch, output_size)
    assert jnp.allclose(yhat, ref, atol=1e-5, rtol=1e-5)

    print("KERNEL_OK")
</pallas_src>

<mosaic_0001>
module attributes {stable_mosaic.version = 11 : i64} {
  func.func @_linear_kernel_single_k(%arg0: i32, %arg1: i32, %arg2: i32, %arg3: memref<8x32xf32, #tpu.memory_space<vmem>>, %arg4: memref<16x32xf32, #tpu.memory_space<vmem>>, %arg5: memref<8x16xf32, #tpu.memory_space<vmem>>) attributes {dimension_semantics = [#tpu.dimension_semantics<parallel>, #tpu.dimension_semantics<parallel>, #tpu.dimension_semantics<arbitrary>], iteration_bounds = array<i64: 1, 1, 1>, scalar_prefetch = 0 : i64, scratch_operands = 0 : i64, tpu.core_type = #tpu.core_type<tc>, window_params = [{transform_indices = @transform_0, window_bounds = array<i64: 8, 32>}, {transform_indices = @transform_1, window_bounds = array<i64: 16, 32>}, {transform_indices = @transform_2, window_bounds = array<i64: 8, 16>}]} {
    %c0 = arith.constant 0 : index
    %c0_0 = arith.constant 0 : index
    %0 = vector.load %arg3[%c0, %c0_0] : memref<8x32xf32, #tpu.memory_space<vmem>>, vector<8x32xf32>
    %c0_1 = arith.constant 0 : index
    %c0_2 = arith.constant 0 : index
    %1 = vector.load %arg4[%c0_1, %c0_2] : memref<16x32xf32, #tpu.memory_space<vmem>>, vector<16x32xf32>
    %cst = arith.constant dense<0.000000e+00> : vector<8x16xf32>
    %2 = tpu.matmul %0, %1, %cst {dimension_numbers = #tpu.dot_dimension_numbers<[1], [1], [0], [0], [0, 0, 1, 0], [], []>} : vector<8x32xf32>, vector<16x32xf32>, vector<8x16xf32> -> vector<8x16xf32>
    %c0_3 = arith.constant 0 : index
    %c0_4 = arith.constant 0 : index
    %3 = vector.load %arg5[%c0_3, %c0_4] : memref<8x16xf32, #tpu.memory_space<vmem>>, vector<8x16xf32>
    tpu.vector_store %arg5[%c0_3, %c0_4], %2 {strides = array<i32>} : memref<8x16xf32, #tpu.memory_space<vmem>>, vector<8x16xf32>,
    return
  }
  func.func @transform_0(%arg0: i32, %arg1: i32, %arg2: i32) -> (i32, i32) {
    %c0_i32 = arith.constant 0 : i32
    return %arg0, %arg2 : i32, i32
  }
  func.func @transform_1(%arg0: i32, %arg1: i32, %arg2: i32) -> (i32, i32) {
    %c0_i32 = arith.constant 0 : i32
    return %arg1, %arg2 : i32, i32
  }
  func.func @transform_2(%arg0: i32, %arg1: i32, %arg2: i32) -> (i32, i32) {
    %c0_i32 = arith.constant 0 : i32
    return %arg0, %arg1 : i32, i32
  }
}

</mosaic_0001>

<bundles_post_ra>
// kernel: tpu_custom_call.1
= control target key start
LH: loop header
LB: loop body
LE: loop exit
PB: predicated region body
PF: predicated region fallthrough
CT: control target
= control target key end

     0   :  { %7 = vsyncpa [#allocation3], 0  ;;  %s210_s0 = inlined_call_operand.hbm [shape: f32[8,32], index: 0, kind: input, shape index: {}]   ;;  %s211_s1 = inlined_call_operand.hbm [shape: f32[16,32], index: 1, kind: input, shape index: {}]   ;;  %s212_s2 = inlined_call_operand.hbm [shape: f32[8,16], index: 2, kind: output, shape index: {}]  }
   0x1   :  { %8 = vsyncpa [#allocation6], 0 }
   0x2   :  { %9 = vsyncpa [#allocation4], 0  ;;  %s15_s11 = sshll.u32 %s210_s0, 4  ;;  %s181_s12 = smov [#allocation2]   ;;  %s16_s11 = int_to_ptr.hbm [resolvable:$true] %s15_s11 }
   0x3   :  { %s17_s13 = sshll.u32 %s181_s12, 4  ;;  %s25_s16 = sshll.u32 %s211_s1, 4  ;;  %s18_s13 = int_to_ptr.vmem [resolvable:$true] %s17_s13  ;;  %s26_s16 = int_to_ptr.hbm [resolvable:$true] %s25_s16 }
   0x4   :  { %20 = dma.hbm_to_vmem [thread:$0]  %s16_s11, 128, %s18_s13, [#allocation3]  }
   0x5   :  { %s182_s17 = smov [#allocation5]   ;;  %s183_s19 = smov 128  }
   0x6   :  { %s27_s18 = sshll.u32 %s182_s17, 4  ;;  %s184_s20 = smov 8   ;;  %s28_s18 = int_to_ptr.vmem [resolvable:$true] %s27_s18 }
   0x7   :  { %33 = dma.hbm_to_vmem [thread:$0]  %s26_s16, 256, %s28_s18, [#allocation6], %s183_s19, %s183_s19, %s184_s20  }
   0x8   :  { %175 = dma.done.wait [#allocation3], 128  }
   0x9   :  { %176 = vsyncadd [#allocation3], 4294967168 }
   0xa   :  { %177 = dma.done.wait [#allocation6], 256  }
   0xb   :  { %178 = vsyncadd [#allocation6], 4294967040  ;;  %vm45_vm0 = vcmask 261120   ;;  %v44_v0 = vld [vmem:[#allocation5 + $0x8] sm:$0xff]  ;;  %v43_v1 = vld [vmem:[#allocation5] sm:$0xff]  ;;  %s185_s0 = smov [#allocation7]  }
   0xc   :  { %95 = vmatpush.xpose.msk.msra.mxu0 %vm45_vm0, %v44_v0  ;;  %v42_v2 = vld [vmem:[#allocation2] sm:$0xff]  ;;  %s82_s1 = sshll.u32 %s185_s0, 4  ;;  %s84_s23 = sshll.u32 %s212_s2, 4  ;;  %vm75_vm1 = vcmask 130048   ;;  %s83_s1 = int_to_ptr.vmem [resolvable:$true] %s82_s1  ;;  %s85_s23 = int_to_ptr.hbm [resolvable:$true] %s84_s23 }
  0x10   :  { %96 = vmatpush.xpose.msk.msra.mxu0 %vm45_vm0, %v43_v1 }
  0x13   :  { %97 = vmatmul.msk.f32.vlgmr.msra.gmra.mxu0 %vm45_vm0, %v42_v2 }
  0x90   :  { %v72_v3 = vpop.f32.mrf.mxu0 }
  0x91   :  { %76 = vst.msk [vmem:[#allocation7] sm:$0xff] %vm75_vm1, %v72_v3 }
  0x92   :  { %87 = dma.vmem_to_hbm [thread:$0]  %s83_s1, 128, %s85_s23, [#allocation4]  }
  0x93   :  { %179 = dma.done.wait [#allocation4], 128  }
  0x94   :  { %180 = vsyncadd [#allocation4], 4294967168 }
  0x95   :  { %92 = vsyncpa [#allocation3], 1 }
  0x96   :  { %93 = vsyncpa [#allocation6], 1 }
  0x97   :  { %94 = vsyncpa [#allocation4], 1 }

</bundles_post_ra>
